<compile_context>
chip_gen: v5e
topology: v5e:2x2
jax: 0.10.0
libtpu: 0.0.40
codegen_flags: <defaults>
</compile_context>

<pallas_src>
import jax
import jax.numpy as jnp
from jax.experimental import pallas as pl
from jax.experimental.pallas import tpu as pltpu


def _round_up(x, m):
    return (x + m - 1) // m * m


def _pj_classifier_kernel(x_ref, w_ref, b_ref, o_ref, acc_ref):
    # x_ref:   (tb, tk)  bf16
    # w_ref:   (tk, tn)  bf16  -- weight already in [K, N] layout
    # b_ref:   (1,  tn)  f32
    # o_ref:   (tb, tn)  f32
    # acc_ref: (tb, tn)  f32 VMEM scratch, persists across the K axis
    k = pl.program_id(2)

    @pl.when(k == 0)
    def _():
        acc_ref[...] = jnp.zeros_like(acc_ref)

    acc_ref[...] += jnp.dot(x_ref[...], w_ref[...],
                            preferred_element_type=jnp.float32)

    @pl.when(k == pl.num_programs(2) - 1)
    def _():
        o_ref[...] = jnp.tanh(acc_ref[...] + b_ref[...]).astype(o_ref.dtype)


def pj_classifier_forward(x, weight, bias, *,
                          compute_dtype=jnp.bfloat16,
                          out_dtype=jnp.float32,
                          block_b_max=None, block_n_max=512, block_k_max=1024):
    """x: (B, inp_dim) f32; weight: (latent_dim, inp_dim) f32 (PyTorch layout);
    bias: (latent_dim,) f32. Returns (B, latent_dim) in `out_dtype`."""
    B, inp_dim = x.shape
    latent_dim, k_dim = weight.shape
    assert k_dim == inp_dim and bias.shape == (latent_dim,)

    # ---- generation-aware VMEM budget -------------------------------------
    try:
        vmem_cap = int(pltpu.get_tpu_info().vmem_capacity_bytes)
    except Exception:  # pragma: no cover - conservative fallback
        vmem_cap = 64 << 20  # v7x per-TC VMEM

    if block_b_max is None:
        # v5e/v6e (128 MiB VMEM, lowest HBM BW on v5e): push the batch tile up.
        block_b_max = 1024 if vmem_cap >= (96 << 20) else 512

    # ---- tile sizes --------------------------------------------------------
    # Lane-dense output: pad latent_dim to a multiple of 128 (zero cols, sliced off).
    n_pad = _round_up(latent_dim, 128)
    tn = min(block_n_max, n_pad)

    # Balanced batch tiles, multiple of 8 sublanes; NO jnp.pad of x on batch.
    n_bt = pl.cdiv(B, block_b_max)
    tb = _round_up(pl.cdiv(B, n_bt), 8)

    # K tile: full inp_dim when it fits; otherwise a 128-multiple with zero-pad
    # on the (cheap, bf16) operands so the K reduction never sees garbage.
    if inp_dim <= block_k_max:
        tk, k_pad = inp_dim, inp_dim
    else:
        tk = block_k_max
        k_pad = _round_up(inp_dim, tk)

    in_itemsize = jnp.dtype(compute_dtype).itemsize
    out_itemsize = jnp.dtype(out_dtype).itemsize

    def _footprint(tb_, tn_, tk_):
        x_b = 2 * tb_ * tk_ * in_itemsize      # double-buffered
        w_b = 2 * tk_ * tn_ * in_itemsize      # double-buffered (varies w/ grid)
        b_b = 2 * tn_ * 4
        o_b = 2 * tb_ * tn_ * out_itemsize
        acc = tb_ * tn_ * 4
        return x_b + w_b + b_b + o_b + acc

    budget = max(16 << 20, vmem_cap // 2)
    while _footprint(tb, tn, tk) > budget and (tb > 8 or tn > 128):
        if tb >= tn and tb > 8:
            tb = max(8, _round_up(tb // 2, 8))
        elif tn > 128:
            tn = max(128, _round_up(tn // 2, 128))
        else:
            break

    grid = (pl.cdiv(B, tb), pl.cdiv(n_pad, tn), k_pad // tk)

    # ---- operand packing (one cast pass; transpose fused into the cast) ----
    x_c = x.astype(compute_dtype)
    # TODO(synk): store the parameter as bf16 [K, N] upstream to skip this per-call cast.
    w_kn = weight.T.astype(compute_dtype)
    if n_pad != latent_dim:
        w_kn = jnp.pad(w_kn, ((0, 0), (0, n_pad - latent_dim)))
    if k_pad != inp_dim:
        x_c = jnp.pad(x_c, ((0, 0), (0, k_pad - inp_dim)))
        w_kn = jnp.pad(w_kn, ((0, k_pad - inp_dim), (0, 0)))
    b2d = jnp.pad(bias.astype(jnp.float32),
                  (0, n_pad - latent_dim)).reshape(1, n_pad)

    cost = pl.CostEstimate(
        flops=2 * B * inp_dim * n_pad,
        transcendentals=B * n_pad,
        bytes_accessed=in_itemsize * (B * k_pad + k_pad * n_pad)
                       + 4 * n_pad + out_itemsize * B * n_pad,
    )

    fp = _footprint(tb, tn, tk)
    vmem_limit = int(min(max(2 * fp + (4 << 20), 32 << 20),
                         max(vmem_cap - (8 << 20), 32 << 20)))

    out_p = pl.pallas_call(
        _pj_classifier_kernel,
        out_shape=jax.ShapeDtypeStruct((B, n_pad), out_dtype),
        grid_spec=pltpu.PrefetchScalarGridSpec(
            num_scalar_prefetch=0,
            grid=grid,
            in_specs=[
                pl.BlockSpec((tb, tk), lambda i, j, k: (i, k)),   # x tile
                pl.BlockSpec((tk, tn), lambda i, j, k: (k, j)),   # weight [K,N] tile
                pl.BlockSpec((1, tn), lambda i, j, k: (0, j)),    # bias tile
            ],
            out_specs=pl.BlockSpec((tb, tn), lambda i, j, k: (i, j)),
            scratch_shapes=[pltpu.VMEM((tb, tn), jnp.float32)],
        ),
        compiler_params=pltpu.CompilerParams(
            # batch & N are independent ("parallel" -> megacore-shardable on
            # v7x); K is the reduction axis, innermost and "arbitrary".
            dimension_semantics=("parallel", "parallel", "arbitrary"),
            vmem_limit_bytes=vmem_limit,
        ),
        cost_estimate=cost,
    )(x_c, w_kn, b2d)

    return out_p[:, :latent_dim]


if __name__ == "__main__":
    # Small shapes consistent with the module: batch=8, inp_dim=32, latent_dim=16
    B, inp_dim, latent_dim = 8, 32, 16

    key = jax.random.PRNGKey(0)
    kx, kw, kb = jax.random.split(key, 3)

    x = jax.random.normal(kx, (B, inp_dim), dtype=jnp.float32)
    # PyTorch-like init: uniform(-1/sqrt(inp_dim), 1/sqrt(inp_dim))
    bound = 1.0 / jnp.sqrt(jnp.float32(inp_dim))
    weight = jax.random.uniform(kw, (latent_dim, inp_dim), jnp.float32, -bound, bound)
    bias = jax.random.uniform(kb, (latent_dim,), jnp.float32, -bound, bound)

    out = pj_classifier_forward(x, weight, bias)
    out = jax.block_until_ready(out)

    # Reference check in plain JAX (same semantics as torch.tanh(Linear(x)));
    # bf16 operands vs f32 reference -> bf16-level tolerance.
    ref = jnp.tanh(x @ weight.T + bias)
    assert out.shape == (B, latent_dim)
    assert out.dtype == jnp.float32
    assert jnp.allclose(out, ref, atol=5e-2, rtol=5e-2), \
        float(jnp.max(jnp.abs(out - ref)))

    print("KERNEL_OK")
</pallas_src>

<mosaic_0001>
module attributes {stable_mosaic.version = 11 : i64} {
  func.func @_pj_classifier_kernel(%arg0: i32, %arg1: i32, %arg2: i32, %arg3: memref<8x32xbf16, #tpu.memory_space<vmem>>, %arg4: memref<32x128xbf16, #tpu.memory_space<vmem>>, %arg5: memref<1x128xf32, #tpu.memory_space<vmem>>, %arg6: memref<8x128xf32, #tpu.memory_space<vmem>>, %arg7: memref<8x128xf32, #tpu.memory_space<vmem>>) attributes {dimension_semantics = [#tpu.dimension_semantics<parallel>, #tpu.dimension_semantics<parallel>, #tpu.dimension_semantics<arbitrary>], iteration_bounds = array<i64: 1, 1, 1>, scalar_prefetch = 0 : i64, scratch_operands = 1 : i64, tpu.core_type = #tpu.core_type<tc>, window_params = [{transform_indices = @transform_0, window_bounds = array<i64: 8, 32>}, {transform_indices = @transform_1, window_bounds = array<i64: 32, 128>}, {transform_indices = @transform_2, window_bounds = array<i64: 1, 128>}, {transform_indices = @transform_3, window_bounds = array<i64: 8, 128>}]} {
    %c0_i32 = arith.constant 0 : i32
    %0 = arith.cmpi eq, %arg2, %c0_i32 : i32
    %1 = arith.extui %0 : i1 to i32
    %c0_i32_0 = arith.constant 0 : i32
    %2 = arith.cmpi ne, %1, %c0_i32_0 : i32
    scf.if %2 {
      %cst_10 = arith.constant 0.000000e+00 : f32
      %12 = vector.broadcast %cst_10 : f32 to vector<8x128xf32>
      %c0_11 = arith.constant 0 : index
      %c0_12 = arith.constant 0 : index
      %13 = vector.load %arg7[%c0_11, %c0_12] : memref<8x128xf32, #tpu.memory_space<vmem>>, vector<8x128xf32>
      tpu.vector_store %arg7[%c0_11, %c0_12], %12 {strides = array<i32>} : memref<8x128xf32, #tpu.memory_space<vmem>>, vector<8x128xf32>,
    } else {
    }
    %c0 = arith.constant 0 : index
    %c0_1 = arith.constant 0 : index
    %3 = vector.load %arg7[%c0, %c0_1] : memref<8x128xf32, #tpu.memory_space<vmem>>, vector<8x128xf32>
    %c0_2 = arith.constant 0 : index
    %c0_3 = arith.constant 0 : index
    %4 = vector.load %arg3[%c0_2, %c0_3] : memref<8x32xbf16, #tpu.memory_space<vmem>>, vector<8x32xbf16>
    %c0_4 = arith.constant 0 : index
    %c0_5 = arith.constant 0 : index
    %5 = vector.load %arg4[%c0_4, %c0_5] : memref<32x128xbf16, #tpu.memory_space<vmem>>, vector<32x128xbf16>
    %cst = arith.constant dense<0.000000e+00> : vector<8x128xf32>
    %6 = tpu.matmul %4, %5, %cst {dimension_numbers = #tpu.dot_dimension_numbers<[1], [0], [0], [1], [0, 0, 1, 1], [], []>} : vector<8x32xbf16>, vector<32x128xbf16>, vector<8x128xf32> -> vector<8x128xf32>
    %7 = arith.addf %3, %6 : vector<8x128xf32>
    %c0_6 = arith.constant 0 : index
    %c0_7 = arith.constant 0 : index
    %8 = vector.load %arg7[%c0_6, %c0_7] : memref<8x128xf32, #tpu.memory_space<vmem>>, vector<8x128xf32>
    tpu.vector_store %arg7[%c0_6, %c0_7], %7 {strides = array<i32>} : memref<8x128xf32, #tpu.memory_space<vmem>>, vector<8x128xf32>,
    %c0_i32_8 = arith.constant 0 : i32
    %9 = arith.cmpi eq, %arg2, %c0_i32_8 : i32
    %10 = arith.extui %9 : i1 to i32
    %c0_i32_9 = arith.constant 0 : i32
    %11 = arith.cmpi ne, %10, %c0_i32_9 : i32
    scf.if %11 {
      %c0_10 = arith.constant 0 : index
      %c0_11 = arith.constant 0 : index
      %12 = vector.load %arg7[%c0_10, %c0_11] : memref<8x128xf32, #tpu.memory_space<vmem>>, vector<8x128xf32>
      %c0_12 = arith.constant 0 : index
      %c0_13 = arith.constant 0 : index
      %13 = vector.load %arg5[%c0_12, %c0_13] : memref<1x128xf32, #tpu.memory_space<vmem>>, vector<1x128xf32>
      %14 = vector.broadcast %13 : vector<1x128xf32> to vector<8x128xf32>
      %15 = arith.addf %12, %14 : vector<8x128xf32>
      %16 = math.tanh %15 : vector<8x128xf32>
      %c0_14 = arith.constant 0 : index
      %c0_15 = arith.constant 0 : index
      %17 = vector.load %arg6[%c0_14, %c0_15] : memref<8x128xf32, #tpu.memory_space<vmem>>, vector<8x128xf32>
      tpu.vector_store %arg6[%c0_14, %c0_15], %16 {strides = array<i32>} : memref<8x128xf32, #tpu.memory_space<vmem>>, vector<8x128xf32>,
    } else {
    }
    return
  }
  func.func @transform_0(%arg0: i32, %arg1: i32, %arg2: i32) -> (i32, i32) {
    %c0_i32 = arith.constant 0 : i32
    return %arg0, %arg2 : i32, i32
  }
  func.func @transform_1(%arg0: i32, %arg1: i32, %arg2: i32) -> (i32, i32) {
    %c0_i32 = arith.constant 0 : i32
    return %arg2, %arg1 : i32, i32
  }
  func.func @transform_2(%arg0: i32, %arg1: i32, %arg2: i32) -> (i32, i32) {
    %c0_i32 = arith.constant 0 : i32
    %c0_i32_0 = arith.constant 0 : i32
    return %c0_i32, %arg1 : i32, i32
  }
  func.func @transform_3(%arg0: i32, %arg1: i32, %arg2: i32) -> (i32, i32) {
    %c0_i32 = arith.constant 0 : i32
    return %arg0, %arg1 : i32, i32
  }
}

</mosaic_0001>

<bundles_post_ra>
// kernel: tpu_custom_call.1
= control target key start
LH: loop header
LB: loop body
LE: loop exit
PB: predicated region body
PF: predicated region fallthrough
CT: control target
= control target key end

     0   :  { %8 = vsyncpa [#allocation4], 0  ;;  %s251_s0 = inlined_call_operand.hbm [shape: bf16[8,32], index: 0, kind: input, shape index: {}]   ;;  %s252_s1 = inlined_call_operand.hbm [shape: bf16[32,128], index: 1, kind: input, shape index: {}]   ;;  %s253_s2 = inlined_call_operand.vmem [shape: f32[1,128], index: 2, kind: input, shape index: {}]   ;;  %s254_s3 = inlined_call_operand.hbm [shape: f32[8,128], index: 3, kind: output, shape index: {}]  }
   0x1   :  { %9 = vsyncpa [#allocation7], 0 }
   0x2   :  { %10 = vsyncpa [#allocation5], 0  ;;  %s16_s14 = sshll.u32 %s251_s0, 4  ;;  %s214_s15 = smov [#allocation3]   ;;  %s17_s14 = int_to_ptr.hbm [resolvable:$true] %s16_s14 }
   0x3   :  { %s18_s16 = sshll.u32 %s214_s15, 4  ;;  %s26_s19 = sshll.u32 %s252_s1, 4  ;;  %s19_s16 = int_to_ptr.vmem [resolvable:$true] %s18_s16  ;;  %s27_s19 = int_to_ptr.hbm [resolvable:$true] %s26_s19 }
   0x4   :  { %21 = dma.hbm_to_vmem [thread:$0]  %s17_s14, 64, %s19_s16, [#allocation4]  }
   0x5   :  { %s215_s20 = smov [#allocation6]   ;;  %s216_s22 = smov 64  }
   0x6   :  { %s28_s21 = sshll.u32 %s215_s20, 4  ;;  %s217_s23 = smov 4   ;;  %s29_s21 = int_to_ptr.vmem [resolvable:$true] %s28_s21 }
   0x7   :  { %34 = dma.hbm_to_vmem [thread:$0]  %s27_s19, 256, %s29_s21, [#allocation7], %s216_s22, %s216_s22, %s217_s23  }
   0x8   :  { %208 = dma.done.wait [#allocation4], 64  }
   0x9   :  { %209 = vsyncadd [#allocation4], 4294967232 }
   0xa   :  { %210 = dma.done.wait [#allocation7], 256  }
   0xb   :  { %211 = vsyncadd [#allocation7], 4294967040  ;;  %v127_v0 = vld [vmem:[#allocation6 + $0x8] sm:$0xff]  ;;  %v126_v1 = vld [vmem:[#allocation6] sm:$0xff]  ;;  %vm69_vm0 = vcmask 261120   ;;  %s218_s24 = smov [#allocation8]  }
   0xc   :  { %79 = vmatpush.bf16.msra.mxu0 %v127_v0  ;;  %v52_v2 = vld [vmem:[#allocation3] sm:$0xf]  ;;  %s104_s25 = sshll.u32 %s218_s24, 4  ;;  %s106_s28 = sshll.u32 %s254_s3, 4  ;;  %s105_s25 = int_to_ptr.vmem [resolvable:$true] %s104_s25  ;;  %s107_s28 = int_to_ptr.hbm [resolvable:$true] %s106_s28 }
   0xd   :  { %v133_v3 = vld [vmem:[%s253_s2] ss:$0 sm:$0xff] }
  0x10   :  { %80 = vmatpush.bf16.msra.mxu0 %v126_v1 }
  0x13   :  { %125 = vmatmul.msk.bf16.vlgmr.msra.gmra.mxu0 %vm69_vm0, %v52_v2 }
  0x90   :  { %v82_v4 = vpop.f32.mrf.mxu0 }
  0x91   :  { %v96_v5 = vadd.f32 %v133_v3, %v82_v4 }
  0x93   :  { %134 = vtanh.f32 %v96_v5 }
  0x98   :  { %v84_v6 = vpop.f32.mrf.mxu0 }
  0x99   :  { %v135_v7 = vpop.eup %134 }
  0x9a   :  { %98 = vst [vmem:[#allocation8] sm:$0xff] %v135_v7 }
  0x9b   :  { %109 = dma.vmem_to_hbm [thread:$0]  %s105_s25, 128, %s107_s28, [#allocation5]  }
  0x9c   :  { %212 = dma.done.wait [#allocation5], 128  }
  0x9d   :  { %213 = vsyncadd [#allocation5], 4294967168 }
  0x9e   :  { %114 = vsyncpa [#allocation4], 1 }
  0x9f   :  { %115 = vsyncpa [#allocation7], 1 }
  0xa0   :  { %116 = vsyncpa [#allocation5], 1 }

</bundles_post_ra>
